<compile_context>
chip_gen: v7x
topology: tpu7x:2x2x1
jax: 0.10.0
libtpu: 0.0.40
codegen_flags: <defaults>
</compile_context>

<pallas_src>
import functools

import jax
import jax.numpy as jnp
from jax.experimental import pallas as pl
from jax.experimental.pallas import tpu as pltpu


# ----------------------------- fused kernel ---------------------------------
def _lie_lstm_kernel(packed_ref, fc_ref, out_ref, *, S, B, I, H, G, offs):
    H4 = 4 * H
    r_wih, r_whh, r_bias, r_x = offs

    # Static (free) slices of the packed VMEM buffer.
    wih = packed_ref[r_wih:r_wih + I, 0:H4]          # (I, 4H)
    whh = packed_ref[r_whh:r_whh + H, 0:H4]          # (H, 4H)  loop-invariant MXU RHS
    bias = packed_ref[r_bias:r_bias + 1, 0:H4]       # (1, 4H)  b_ih + b_hh
    x2d = packed_ref[r_x:r_x + S * B, 0:I]           # (S*B, I), row lin = t*B + bb

    # Prologue (no recurrent dependence): input projection + bias for every
    # timestep at once.  pre[t*B + bb, :] = x[t, bb, :] @ W_ih^T + (b_ih + b_hh).
    pre = jnp.dot(x2d, wih, preferred_element_type=jnp.float32) + bias   # (S*B, 4H)

    h = jnp.zeros((B, H), jnp.float32)
    c = jnp.zeros((B, H), jnp.float32)
    # One (1, G) register accumulator per output row of the fused Linear.
    acc = [jnp.zeros((1, G), jnp.float32) for _ in range(B)]

    # Fully unrolled recurrence; S is a compile-time constant so every slice
    # offset below is static.
    for t in range(S):
        gates = pre[t * B:(t + 1) * B, :] + jnp.dot(
            h, whh, preferred_element_type=jnp.float32)                  # (B, 4H)

        # Two full-width (B, 4H) nonlinearity passes, then static slices
        # (PyTorch gate order: i, f, g, o).
        sig = jax.nn.sigmoid(gates)
        th = jnp.tanh(gates)
        i_g = sig[:, 0 * H:1 * H]
        f_g = sig[:, 1 * H:2 * H]
        g_g = th[:, 2 * H:3 * H]
        o_g = sig[:, 3 * H:4 * H]

        c = f_g * c + i_g * g_g
        h = o_g * jnp.tanh(c)

        # Fused Linear, accumulated per step (replaces the scatter + scratch
        # + epilogue matmul).  Element (t, bb, :) of the seq-first LSTM output
        # lands, after torch's `.view(batch, -1)`, at
        #   flat[(t*B+bb)//S, ((t*B+bb)%S)*H : +H]
        # so its FC contribution is h[bb] @ Wfc^T[((t*B+bb)%S)*H : +H, :]
        # added to output row (t*B+bb)//S.  These dots do not feed h/c, so
        # they overlap with the next step's gate matmul.
        for bb in range(B):
            lin = t * B + bb
            row = lin // S
            blk = lin % S
            w_blk = fc_ref[blk * H:(blk + 1) * H, :]                     # (H, G)
            acc[row] = acc[row] + jnp.dot(
                h[bb:bb + 1, :], w_blk, preferred_element_type=jnp.float32)

    # Epilogue: add FC bias; the only HBM-bound result is the (B, G) logits.
    bfc = fc_ref[S * H:S * H + 1, :]                                     # (1, G)
    for row in range(B):
        out_ref[row:row + 1, :] = acc[row] + bfc


def lie_lstm_forward(x, w_ih, w_hh, b_ih, b_hh, w_fc, b_fc):
    S, B, I = x.shape
    H4 = w_ih.shape[0]
    H = H4 // 4
    G = w_fc.shape[0]

    # ---- trace-time packing: collapse six tiny prologue DMAs into two ----
    width = max(H4, I)

    def _pad_block(a):                       # pad rows to 8 (aligned slices)
        r_pad = (-a.shape[0]) % 8            # and lanes to the common width
        return jnp.pad(a, ((0, r_pad), (0, width - a.shape[1])))

    x2d = jnp.reshape(x, (S * B, I))                       # row lin = t*B + bb
    blocks = [
        jnp.transpose(w_ih),                               # (I, 4H)
        jnp.transpose(w_hh),                               # (H, 4H)
        (b_ih + b_hh).reshape(1, H4),                      # (1, 4H)
        x2d,                                               # (S*B, I)
    ]
    offs = []
    off = 0
    for blk in blocks:
        offs.append(off)
        off += (blk.shape[0] + 7) // 8 * 8
    packed = jnp.concatenate([_pad_block(b) for b in blocks],
                             axis=0).astype(jnp.float32)   # (~72, width)

    fc_packed = jnp.concatenate([
        jnp.transpose(w_fc),                               # (S*H, G)
        b_fc.reshape(1, G),                                # (1, G)
    ], axis=0).astype(jnp.float32)                         # (S*H + 1, G)

    kernel = functools.partial(_lie_lstm_kernel, S=S, B=B, I=I, H=H, G=G,
                               offs=tuple(offs))
    vmem_spec = pl.BlockSpec(memory_space=pltpu.MemorySpace.VMEM)

    return pl.pallas_call(
        kernel,
        out_shape=jax.ShapeDtypeStruct((B, G), jnp.float32),
        in_specs=[vmem_spec, vmem_spec],
        out_specs=vmem_spec,
    )(packed, fc_packed)


# ----------------------------- Pure-JAX reference ----------------------------
def reference_forward(x, w_ih, w_hh, b_ih, b_hh, w_fc, b_fc):
    S, B, _ = x.shape
    H = w_hh.shape[1]

    def step(carry, xt):
        h, c = carry
        gates = xt @ w_ih.T + h @ w_hh.T + b_ih + b_hh
        i, f, g, o = jnp.split(gates, 4, axis=-1)
        i = jax.nn.sigmoid(i)
        f = jax.nn.sigmoid(f)
        g = jnp.tanh(g)
        o = jax.nn.sigmoid(o)
        c = f * c + i * g
        h = o * jnp.tanh(c)
        return (h, c), h

    init = (jnp.zeros((B, H), jnp.float32), jnp.zeros((B, H), jnp.float32))
    _, hs = jax.lax.scan(step, init, x)          # (S, B, H)
    # Mirrors torch: lstm_out.contiguous().view(batch, -1) on a seq-first tensor.
    flat = jnp.reshape(hs, (B, S * H))
    return flat @ w_fc.T + b_fc


if __name__ == "__main__":
    hidden_dim, input_size, gesture_size, seq_len = 32, 16, 8, 8
    batch = 2

    key = jax.random.PRNGKey(0)
    ks = jax.random.split(key, 7)

    bound = 1.0 / (hidden_dim ** 0.5)
    w_ih = jax.random.uniform(ks[0], (4 * hidden_dim, input_size),
                              minval=-bound, maxval=bound, dtype=jnp.float32)
    w_hh = jax.random.uniform(ks[1], (4 * hidden_dim, hidden_dim),
                              minval=-bound, maxval=bound, dtype=jnp.float32)
    b_ih = jax.random.uniform(ks[2], (4 * hidden_dim,),
                              minval=-bound, maxval=bound, dtype=jnp.float32)
    b_hh = jax.random.uniform(ks[3], (4 * hidden_dim,),
                              minval=-bound, maxval=bound, dtype=jnp.float32)

    lin_bound = 1.0 / ((hidden_dim * seq_len) ** 0.5)
    w_fc = jax.random.uniform(ks[4], (gesture_size, hidden_dim * seq_len),
                              minval=-lin_bound, maxval=lin_bound,
                              dtype=jnp.float32)
    b_fc = jax.random.uniform(ks[5], (gesture_size,),
                              minval=-lin_bound, maxval=lin_bound,
                              dtype=jnp.float32)

    x = jax.random.normal(ks[6], (seq_len, batch, input_size), dtype=jnp.float32)

    out = jax.block_until_ready(
        lie_lstm_forward(x, w_ih, w_hh, b_ih, b_hh, w_fc, b_fc))

    ref = jax.block_until_ready(
        reference_forward(x, w_ih, w_hh, b_ih, b_hh, w_fc, b_fc))

    err = float(jnp.max(jnp.abs(out - ref)))
    if err > 5e-3:
        raise AssertionError(f"Pallas output mismatch vs reference: max err {err}")

    print("KERNEL_OK")
</pallas_src>

<mosaic_0001>
module attributes {stable_mosaic.version = 11 : i64} {
  func.func @_lie_lstm_kernel(%arg0: memref<72x128xf32, #tpu.memory_space<vmem>>, %arg1: memref<257x8xf32, #tpu.memory_space<vmem>>, %arg2: memref<2x8xf32, #tpu.memory_space<vmem>>) attributes {dimension_semantics = [], scalar_prefetch = 0 : i64, scratch_operands = 0 : i64, tpu.core_type = #tpu.core_type<tc>} {
    %c0 = arith.constant 0 : index
    %c0_0 = arith.constant 0 : index
    %0 = vector.load %arg0[%c0, %c0_0] : memref<72x128xf32, #tpu.memory_space<vmem>>, vector<16x128xf32>
    %c16 = arith.constant 16 : index
    %c0_1 = arith.constant 0 : index
    %1 = vector.load %arg0[%c16, %c0_1] : memref<72x128xf32, #tpu.memory_space<vmem>>, vector<32x128xf32>
    %c48 = arith.constant 48 : index
    %c0_2 = arith.constant 0 : index
    %2 = vector.load %arg0[%c48, %c0_2] : memref<72x128xf32, #tpu.memory_space<vmem>>, vector<1x128xf32>
    %c56 = arith.constant 56 : index
    %c0_3 = arith.constant 0 : index
    %3 = vector.load %arg0[%c56, %c0_3] : memref<72x128xf32, #tpu.memory_space<vmem>>, vector<16x16xf32>
    %cst = arith.constant dense<0.000000e+00> : vector<16x128xf32>
    %4 = tpu.matmul %3, %0, %cst {dimension_numbers = #tpu.dot_dimension_numbers<[1], [0], [0], [1], [0, 0, 1, 1], [], []>} : vector<16x16xf32>, vector<16x128xf32>, vector<16x128xf32> -> vector<16x128xf32>
    %5 = vector.broadcast %2 : vector<1x128xf32> to vector<16x128xf32>
    %6 = arith.addf %4, %5 : vector<16x128xf32>
    %cst_4 = arith.constant 0.000000e+00 : f32
    %7 = vector.broadcast %cst_4 : f32 to vector<2x32xf32>
    %cst_5 = arith.constant 0.000000e+00 : f32
    %8 = vector.broadcast %cst_5 : f32 to vector<2x32xf32>
    %cst_6 = arith.constant 0.000000e+00 : f32
    %9 = vector.broadcast %cst_6 : f32 to vector<1x8xf32>
    %cst_7 = arith.constant 0.000000e+00 : f32
    %10 = vector.broadcast %cst_7 : f32 to vector<1x8xf32>
    %11 = vector.extract_strided_slice %6 {offsets = [0, 0], sizes = [2, 128], strides = [1, 1]} : vector<16x128xf32> to vector<2x128xf32>
    %cst_8 = arith.constant dense<0.000000e+00> : vector<2x128xf32>
    %12 = tpu.matmul %7, %1, %cst_8 {dimension_numbers = #tpu.dot_dimension_numbers<[1], [0], [0], [1], [0, 0, 1, 1], [], []>} : vector<2x32xf32>, vector<32x128xf32>, vector<2x128xf32> -> vector<2x128xf32>
    %13 = arith.addf %11, %12 : vector<2x128xf32>
    %14 = arith.negf %13 : vector<2x128xf32>
    %15 = math.exp %14 : vector<2x128xf32>
    %cst_9 = arith.constant 1.000000e+00 : f32
    %16 = vector.broadcast %cst_9 : f32 to vector<2x128xf32>
    %17 = arith.addf %16, %15 : vector<2x128xf32>
    %18 = arith.divf %16, %17 : vector<2x128xf32>
    %19 = math.tanh %13 : vector<2x128xf32>
    %20 = vector.extract_strided_slice %18 {offsets = [0, 0], sizes = [2, 32], strides = [1, 1]} : vector<2x128xf32> to vector<2x32xf32>
    %21 = vector.extract_strided_slice %18 {offsets = [0, 32], sizes = [2, 32], strides = [1, 1]} : vector<2x128xf32> to vector<2x32xf32>
    %22 = vector.extract_strided_slice %19 {offsets = [0, 64], sizes = [2, 32], strides = [1, 1]} : vector<2x128xf32> to vector<2x32xf32>
    %23 = vector.extract_strided_slice %18 {offsets = [0, 96], sizes = [2, 32], strides = [1, 1]} : vector<2x128xf32> to vector<2x32xf32>
    %24 = arith.mulf %21, %8 : vector<2x32xf32>
    %25 = arith.mulf %20, %22 : vector<2x32xf32>
    %26 = arith.addf %24, %25 : vector<2x32xf32>
    %27 = math.tanh %26 : vector<2x32xf32>
    %28 = arith.mulf %23, %27 : vector<2x32xf32>
    %c0_10 = arith.constant 0 : index
    %c0_11 = arith.constant 0 : index
    %29 = vector.load %arg1[%c0_10, %c0_11] : memref<257x8xf32, #tpu.memory_space<vmem>>, vector<32x8xf32>
    %30 = vector.extract_strided_slice %28 {offsets = [0, 0], sizes = [1, 32], strides = [1, 1]} : vector<2x32xf32> to vector<1x32xf32>
    %cst_12 = arith.constant dense<0.000000e+00> : vector<1x8xf32>
    %31 = tpu.matmul %30, %29, %cst_12 {dimension_numbers = #tpu.dot_dimension_numbers<[1], [0], [0], [1], [0, 0, 1, 1], [], []>} : vector<1x32xf32>, vector<32x8xf32>, vector<1x8xf32> -> vector<1x8xf32>
    %32 = arith.addf %9, %31 : vector<1x8xf32>
    %c32 = arith.constant 32 : index
    %c0_13 = arith.constant 0 : index
    %33 = vector.load %arg1[%c32, %c0_13] : memref<257x8xf32, #tpu.memory_space<vmem>>, vector<32x8xf32>
    %34 = vector.extract_strided_slice %28 {offsets = [1, 0], sizes = [1, 32], strides = [1, 1]} : vector<2x32xf32> to vector<1x32xf32>
    %cst_14 = arith.constant dense<0.000000e+00> : vector<1x8xf32>
    %35 = tpu.matmul %34, %33, %cst_14 {dimension_numbers = #tpu.dot_dimension_numbers<[1], [0], [0], [1], [0, 0, 1, 1], [], []>} : vector<1x32xf32>, vector<32x8xf32>, vector<1x8xf32> -> vector<1x8xf32>
    %36 = arith.addf %32, %35 : vector<1x8xf32>
    %37 = vector.extract_strided_slice %6 {offsets = [2, 0], sizes = [2, 128], strides = [1, 1]} : vector<16x128xf32> to vector<2x128xf32>
    %cst_15 = arith.constant dense<0.000000e+00> : vector<2x128xf32>
    %38 = tpu.matmul %28, %1, %cst_15 {dimension_numbers = #tpu.dot_dimension_numbers<[1], [0], [0], [1], [0, 0, 1, 1], [], []>} : vector<2x32xf32>, vector<32x128xf32>, vector<2x128xf32> -> vector<2x128xf32>
    %39 = arith.addf %37, %38 : vector<2x128xf32>
    %40 = arith.negf %39 : vector<2x128xf32>
    %41 = math.exp %40 : vector<2x128xf32>
    %cst_16 = arith.constant 1.000000e+00 : f32
    %42 = vector.broadcast %cst_16 : f32 to vector<2x128xf32>
    %43 = arith.addf %42, %41 : vector<2x128xf32>
    %44 = arith.divf %42, %43 : vector<2x128xf32>
    %45 = math.tanh %39 : vector<2x128xf32>
    %46 = vector.extract_strided_slice %44 {offsets = [0, 0], sizes = [2, 32], strides = [1, 1]} : vector<2x128xf32> to vector<2x32xf32>
    %47 = vector.extract_strided_slice %44 {offsets = [0, 32], sizes = [2, 32], strides = [1, 1]} : vector<2x128xf32> to vector<2x32xf32>
    %48 = vector.extract_strided_slice %45 {offsets = [0, 64], sizes = [2, 32], strides = [1, 1]} : vector<2x128xf32> to vector<2x32xf32>
    %49 = vector.extract_strided_slice %44 {offsets = [0, 96], sizes = [2, 32], strides = [1, 1]} : vector<2x128xf32> to vector<2x32xf32>
    %50 = arith.mulf %47, %26 : vector<2x32xf32>
    %51 = arith.mulf %46, %48 : vector<2x32xf32>
    %52 = arith.addf %50, %51 : vector<2x32xf32>
    %53 = math.tanh %52 : vector<2x32xf32>
    %54 = arith.mulf %49, %53 : vector<2x32xf32>
    %c64 = arith.constant 64 : index
    %c0_17 = arith.constant 0 : index
    %55 = vector.load %arg1[%c64, %c0_17] : memref<257x8xf32, #tpu.memory_space<vmem>>, vector<32x8xf32>
    %56 = vector.extract_strided_slice %54 {offsets = [0, 0], sizes = [1, 32], strides = [1, 1]} : vector<2x32xf32> to vector<1x32xf32>
    %cst_18 = arith.constant dense<0.000000e+00> : vector<1x8xf32>
    %57 = tpu.matmul %56, %55, %cst_18 {dimension_numbers = #tpu.dot_dimension_numbers<[1], [0], [0], [1], [0, 0, 1, 1], [], []>} : vector<1x32xf32>, vector<32x8xf32>, vector<1x8xf32> -> vector<1x8xf32>
    %58 = arith.addf %36, %57 : vector<1x8xf32>
    %c96 = arith.constant 96 : index
    %c0_19 = arith.constant 0 : index
    %59 = vector.load %arg1[%c96, %c0_19] : memref<257x8xf32, #tpu.memory_space<vmem>>, vector<32x8xf32>
    %60 = vector.extract_strided_slice %54 {offsets = [1, 0], sizes = [1, 32], strides = [1, 1]} : vector<2x32xf32> to vector<1x32xf32>
    %cst_20 = arith.constant dense<0.000000e+00> : vector<1x8xf32>
    %61 = tpu.matmul %60, %59, %cst_20 {dimension_numbers = #tpu.dot_dimension_numbers<[1], [0], [0], [1], [0, 0, 1, 1], [], []>} : vector<1x32xf32>, vector<32x8xf32>, vector<1x8xf32> -> vector<1x8xf32>
    %62 = arith.addf %58, %61 : vector<1x8xf32>
    %63 = vector.extract_strided_slice %6 {offsets = [4, 0], sizes = [2, 128], strides = [1, 1]} : vector<16x128xf32> to vector<2x128xf32>
    %cst_21 = arith.constant dense<0.000000e+00> : vector<2x128xf32>
    %64 = tpu.matmul %54, %1, %cst_21 {dimension_numbers = #tpu.dot_dimension_numbers<[1], [0], [0], [1], [0, 0, 1, 1], [], []>} : vector<2x32xf32>, vector<32x128xf32>, vector<2x128xf32> -> vector<2x128xf32>
    %65 = arith.addf %63, %64 : vector<2x128xf32>
    %66 = arith.negf %65 : vector<2x128xf32>
    %67 = math.exp %66 : vector<2x128xf32>
    %cst_22 = arith.constant 1.000000e+00 : f32
    %68 = vector.broadcast %cst_22 : f32 to vector<2x128xf32>
    %69 = arith.addf %68, %67 : vector<2x128xf32>
    %70 = arith.divf %68, %69 : vector<2x128xf32>
    %71 = math.tanh %65 : vector<2x128xf32>
    %72 = vector.extract_strided_slice %70 {offsets = [0, 0], sizes = [2, 32], strides = [1, 1]} : vector<2x128xf32> to vector<2x32xf32>
    %73 = vector.extract_strided_slice %70 {offsets = [0, 32], sizes = [2, 32], strides = [1, 1]} : vector<2x128xf32> to vector<2x32xf32>
    %74 = vector.extract_strided_slice %71 {offsets = [0, 64], sizes = [2, 32], strides = [1, 1]} : vector<2x128xf32> to vector<2x32xf32>
    %75 = vector.extract_strided_slice %70 {offsets = [0, 96], sizes = [2, 32], strides = [1, 1]} : vector<2x128xf32> to vector<2x32xf32>
    %76 = arith.mulf %73, %52 : vector<2x32xf32>
    %77 = arith.mulf %72, %74 : vector<2x32xf32>
    %78 = arith.addf %76, %77 : vector<2x32xf32>
    %79 = math.tanh %78 : vector<2x32xf32>
    %80 = arith.mulf %75, %79 : vector<2x32xf32>
    %c128 = arith.constant 128 : index
    %c0_23 = arith.constant 0 : index
    %81 = vector.load %arg1[%c128, %c0_23] : memref<257x8xf32, #tpu.memory_space<vmem>>, vector<32x8xf32>
    %82 = vector.extract_strided_slice %80 {offsets = [0, 0], sizes = [1, 32], strides = [1, 1]} : vector<2x32xf32> to vector<1x32xf32>
    %cst_24 = arith.constant dense<0.000000e+00> : vector<1x8xf32>
    %83 = tpu.matmul %82, %81, %cst_24 {dimension_numbers = #tpu.dot_dimension_numbers<[1], [0], [0], [1], [0, 0, 1, 1], [], []>} : vector<1x32xf32>, vector<32x8xf32>, vector<1x8xf32> -> vector<1x8xf32>
    %84 = arith.addf %62, %83 : vector<1x8xf32>
    %c160 = arith.constant 160 : index
    %c0_25 = arith.constant 0 : index
    %85 = vector.load %arg1[%c160, %c0_25] : memref<257x8xf32, #tpu.memory_space<vmem>>, vector<32x8xf32>
    %86 = vector.extract_strided_slice %80 {offsets = [1, 0], sizes = [1, 32], strides = [1, 1]} : vector<2x32xf32> to vector<1x32xf32>
    %cst_26 = arith.constant dense<0.000000e+00> : vector<1x8xf32>
    %87 = tpu.matmul %86, %85, %cst_26 {dimension_numbers = #tpu.dot_dimension_numbers<[1], [0], [0], [1], [0, 0, 1, 1], [], []>} : vector<1x32xf32>, vector<32x8xf32>, vector<1x8xf32> -> vector<1x8xf32>
    %88 = arith.addf %84, %87 : vector<1x8xf32>
    %89 = vector.extract_strided_slice %6 {offsets = [6, 0], sizes = [2, 128], strides = [1, 1]} : vector<16x128xf32> to vector<2x128xf32>
    %cst_27 = arith.constant dense<0.000000e+00> : vector<2x128xf32>
    %90 = tpu.matmul %80, %1, %cst_27 {dimension_numbers = #tpu.dot_dimension_numbers<[1], [0], [0], [1], [0, 0, 1, 1], [], []>} : vector<2x32xf32>, vector<32x128xf32>, vector<2x128xf32> -> vector<2x128xf32>
    %91 = arith.addf %89, %90 : vector<2x128xf32>
    %92 = arith.negf %91 : vector<2x128xf32>
    %93 = math.exp %92 : vector<2x128xf32>
    %cst_28 = arith.constant 1.000000e+00 : f32
    %94 = vector.broadcast %cst_28 : f32 to vector<2x128xf32>
    %95 = arith.addf %94, %93 : vector<2x128xf32>
    %96 = arith.divf %94, %95 : vector<2x128xf32>
    %97 = math.tanh %91 : vector<2x128xf32>
    %98 = vector.extract_strided_slice %96 {offsets = [0, 0], sizes = [2, 32], strides = [1, 1]} : vector<2x128xf32> to vector<2x32xf32>
    %99 = vector.extract_strided_slice %96 {offsets = [0, 32], sizes = [2, 32], strides = [1, 1]} : vector<2x128xf32> to vector<2x32xf32>
    %100 = vector.extract_strided_slice %97 {offsets = [0, 64], sizes = [2, 32], strides = [1, 1]} : vector<2x128xf32> to vector<2x32xf32>
    %101 = vector.extract_strided_slice %96 {offsets = [0, 96], sizes = [2, 32], strides = [1, 1]} : vector<2x128xf32> to vector<2x32xf32>
    %102 = arith.mulf %99, %78 : vector<2x32xf32>
    %103 = arith.mulf %98, %100 : vector<2x32xf32>
    %104 = arith.addf %102, %103 : vector<2x32xf32>
    %105 = math.tanh %104 : vector<2x32xf32>
    %106 = arith.mulf %101, %105 : vector<2x32xf32>
    %c192 = arith.constant 192 : index
    %c0_29 = arith.constant 0 : index
    %107 = vector.load %arg1[%c192, %c0_29] : memref<257x8xf32, #tpu.memory_space<vmem>>, vector<32x8xf32>
    %108 = vector.extract_strided_slice %106 {offsets = [0, 0], sizes = [1, 32], strides = [1, 1]} : vector<2x32xf32> to vector<1x32xf32>
    %cst_30 = arith.constant dense<0.000000e+00> : vector<1x8xf32>
    %109 = tpu.matmul %108, %107, %cst_30 {dimension_numbers = #tpu.dot_dimension_numbers<[1], [0], [0], [1], [0, 0, 1, 1], [], []>} : vector<1x32xf32>, vector<32x8xf32>, vector<1x8xf32> -> vector<1x8xf32>
    %110 = arith.addf %88, %109 : vector<1x8xf32>
    %c224 = arith.constant 224 : index
    %c0_31 = arith.constant 0 : index
    %111 = vector.load %arg1[%c224, %c0_31] : memref<257x8xf32, #tpu.memory_space<vmem>>, vector<32x8xf32>
    %112 = vector.extract_strided_slice %106 {offsets = [1, 0], sizes = [1, 32], strides = [1, 1]} : vector<2x32xf32> to vector<1x32xf32>
    %cst_32 = arith.constant dense<0.000000e+00> : vector<1x8xf32>
    %113 = tpu.matmul %112, %111, %cst_32 {dimension_numbers = #tpu.dot_dimension_numbers<[1], [0], [0], [1], [0, 0, 1, 1], [], []>} : vector<1x32xf32>, vector<32x8xf32>, vector<1x8xf32> -> vector<1x8xf32>
    %114 = arith.addf %110, %113 : vector<1x8xf32>
    %115 = vector.extract_strided_slice %6 {offsets = [8, 0], sizes = [2, 128], strides = [1, 1]} : vector<16x128xf32> to vector<2x128xf32>
    %cst_33 = arith.constant dense<0.000000e+00> : vector<2x128xf32>
    %116 = tpu.matmul %106, %1, %cst_33 {dimension_numbers = #tpu.dot_dimension_numbers<[1], [0], [0], [1], [0, 0, 1, 1], [], []>} : vector<2x32xf32>, vector<32x128xf32>, vector<2x128xf32> -> vector<2x128xf32>
    %117 = arith.addf %115, %116 : vector<2x128xf32>
    %118 = arith.negf %117 : vector<2x128xf32>
    %119 = math.exp %118 : vector<2x128xf32>
    %cst_34 = arith.constant 1.000000e+00 : f32
    %120 = vector.broadcast %cst_34 : f32 to vector<2x128xf32>
    %121 = arith.addf %120, %119 : vector<2x128xf32>
    %122 = arith.divf %120, %121 : vector<2x128xf32>
    %123 = math.tanh %117 : vector<2x128xf32>
    %124 = vector.extract_strided_slice %122 {offsets = [0, 0], sizes = [2, 32], strides = [1, 1]} : vector<2x128xf32> to vector<2x32xf32>
    %125 = vector.extract_strided_slice %122 {offsets = [0, 32], sizes = [2, 32], strides = [1, 1]} : vector<2x128xf32> to vector<2x32xf32>
    %126 = vector.extract_strided_slice %123 {offsets = [0, 64], sizes = [2, 32], strides = [1, 1]} : vector<2x128xf32> to vector<2x32xf32>
    %127 = vector.extract_strided_slice %122 {offsets = [0, 96], sizes = [2, 32], strides = [1, 1]} : vector<2x128xf32> to vector<2x32xf32>
    %128 = arith.mulf %125, %104 : vector<2x32xf32>
    %129 = arith.mulf %124, %126 : vector<2x32xf32>
    %130 = arith.addf %128, %129 : vector<2x32xf32>
    %131 = math.tanh %130 : vector<2x32xf32>
    %132 = arith.mulf %127, %131 : vector<2x32xf32>
    %c0_35 = arith.constant 0 : index
    %c0_36 = arith.constant 0 : index
    %133 = vector.load %arg1[%c0_35, %c0_36] : memref<257x8xf32, #tpu.memory_space<vmem>>, vector<32x8xf32>
    %134 = vector.extract_strided_slice %132 {offsets = [0, 0], sizes = [1, 32], strides = [1, 1]} : vector<2x32xf32> to vector<1x32xf32>
    %cst_37 = arith.constant dense<0.000000e+00> : vector<1x8xf32>
    %135 = tpu.matmul %134, %133, %cst_37 {dimension_numbers = #tpu.dot_dimension_numbers<[1], [0], [0], [1], [0, 0, 1, 1], [], []>} : vector<1x32xf32>, vector<32x8xf32>, vector<1x8xf32> -> vector<1x8xf32>
    %136 = arith.addf %10, %135 : vector<1x8xf32>
    %c32_38 = arith.constant 32 : index
    %c0_39 = arith.constant 0 : index
    %137 = vector.load %arg1[%c32_38, %c0_39] : memref<257x8xf32, #tpu.memory_space<vmem>>, vector<32x8xf32>
    %138 = vector.extract_strided_slice %132 {offsets = [1, 0], sizes = [1, 32], strides = [1, 1]} : vector<2x32xf32> to vector<1x32xf32>
    %cst_40 = arith.constant dense<0.000000e+00> : vector<1x8xf32>
    %139 = tpu.matmul %138, %137, %cst_40 {dimension_numbers = #tpu.dot_dimension_numbers<[1], [0], [0], [1], [0, 0, 1, 1], [], []>} : vector<1x32xf32>, vector<32x8xf32>, vector<1x8xf32> -> vector<1x8xf32>
    %140 = arith.addf %136, %139 : vector<1x8xf32>
    %141 = vector.extract_strided_slice %6 {offsets = [10, 0], sizes = [2, 128], strides = [1, 1]} : vector<16x128xf32> to vector<2x128xf32>
    %cst_41 = arith.constant dense<0.000000e+00> : vector<2x128xf32>
    %142 = tpu.matmul %132, %1, %cst_41 {dimension_numbers = #tpu.dot_dimension_numbers<[1], [0], [0], [1], [0, 0, 1, 1], [], []>} : vector<2x32xf32>, vector<32x128xf32>, vector<2x128xf32> -> vector<2x128xf32>
    %143 = arith.addf %141, %142 : vector<2x128xf32>
    %144 = arith.negf %143 : vector<2x128xf32>
    %145 = math.exp %144 : vector<2x128xf32>
    %cst_42 = arith.constant 1.000000e+00 : f32
    %146 = vector.broadcast %cst_42 : f32 to vector<2x128xf32>
    %147 = arith.addf %146, %145 : vector<2x128xf32>
    %148 = arith.divf %146, %147 : vector<2x128xf32>
    %149 = math.tanh %143 : vector<2x128xf32>
    %150 = vector.extract_strided_slice %148 {offsets = [0, 0], sizes = [2, 32], strides = [1, 1]} : vector<2x128xf32> to vector<2x32xf32>
    %151 = vector.extract_strided_slice %148 {offsets = [0, 32], sizes = [2, 32], strides = [1, 1]} : vector<2x128xf32> to vector<2x32xf32>
    %152 = vector.extract_strided_slice %149 {offsets = [0, 64], sizes = [2, 32], strides = [1, 1]} : vector<2x128xf32> to vector<2x32xf32>
    %153 = vector.extract_strided_slice %148 {offsets = [0, 96], sizes = [2, 32], strides = [1, 1]} : vector<2x128xf32> to vector<2x32xf32>
    %154 = arith.mulf %151, %130 : vector<2x32xf32>
    %155 = arith.mulf %150, %152 : vector<2x32xf32>
    %156 = arith.addf %154, %155 : vector<2x32xf32>
    %157 = math.tanh %156 : vector<2x32xf32>
    %158 = arith.mulf %153, %157 : vector<2x32xf32>
    %c64_43 = arith.constant 64 : index
    %c0_44 = arith.constant 0 : index
    %159 = vector.load %arg1[%c64_43, %c0_44] : memref<257x8xf32, #tpu.memory_space<vmem>>, vector<32x8xf32>
    %160 = vector.extract_strided_slice %158 {offsets = [0, 0], sizes = [1, 32], strides = [1, 1]} : vector<2x32xf32> to vector<1x32xf32>
    %cst_45 = arith.constant dense<0.000000e+00> : vector<1x8xf32>
    %161 = tpu.matmul %160, %159, %cst_45 {dimension_numbers = #tpu.dot_dimension_numbers<[1], [0], [0], [1], [0, 0, 1, 1], [], []>} : vector<1x32xf32>, vector<32x8xf32>, vector<1x8xf32> -> vector<1x8xf32>
    %162 = arith.addf %140, %161 : vector<1x8xf32>
    %c96_46 = arith.constant 96 : index
    %c0_47 = arith.constant 0 : index
    %163 = vector.load %arg1[%c96_46, %c0_47] : memref<257x8xf32, #tpu.memory_space<vmem>>, vector<32x8xf32>
    %164 = vector.extract_strided_slice %158 {offsets = [1, 0], sizes = [1, 32], strides = [1, 1]} : vector<2x32xf32> to vector<1x32xf32>
    %cst_48 = arith.constant dense<0.000000e+00> : vector<1x8xf32>
    %165 = tpu.matmul %164, %163, %cst_48 {dimension_numbers = #tpu.dot_dimension_numbers<[1], [0], [0], [1], [0, 0, 1, 1], [], []>} : vector<1x32xf32>, vector<32x8xf32>, vector<1x8xf32> -> vector<1x8xf32>
    %166 = arith.addf %162, %165 : vector<1x8xf32>
    %167 = vector.extract_strided_slice %6 {offsets = [12, 0], sizes = [2, 128], strides = [1, 1]} : vector<16x128xf32> to vector<2x128xf32>
    %cst_49 = arith.constant dense<0.000000e+00> : vector<2x128xf32>
    %168 = tpu.matmul %158, %1, %cst_49 {dimension_numbers = #tpu.dot_dimension_numbers<[1], [0], [0], [1], [0, 0, 1, 1], [], []>} : vector<2x32xf32>, vector<32x128xf32>, vector<2x128xf32> -> vector<2x128xf32>
    %169 = arith.addf %167, %168 : vector<2x128xf32>
    %170 = arith.negf %169 : vector<2x128xf32>
    %171 = math.exp %170 : vector<2x128xf32>
    %cst_50 = arith.constant 1.000000e+00 : f32
    %172 = vector.broadcast %cst_50 : f32 to vector<2x128xf32>
    %173 = arith.addf %172, %171 : vector<2x128xf32>
    %174 = arith.divf %172, %173 : vector<2x128xf32>
    %175 = math.tanh %169 : vector<2x128xf32>
    %176 = vector.extract_strided_slice %174 {offsets = [0, 0], sizes = [2, 32], strides = [1, 1]} : vector<2x128xf32> to vector<2x32xf32>
    %177 = vector.extract_strided_slice %174 {offsets = [0, 32], sizes = [2, 32], strides = [1, 1]} : vector<2x128xf32> to vector<2x32xf32>
    %178 = vector.extract_strided_slice %175 {offsets = [0, 64], sizes = [2, 32], strides = [1, 1]} : vector<2x128xf32> to vector<2x32xf32>
    %179 = vector.extract_strided_slice %174 {offsets = [0, 96], sizes = [2, 32], strides = [1, 1]} : vector<2x128xf32> to vector<2x32xf32>
    %180 = arith.mulf %177, %156 : vector<2x32xf32>
    %181 = arith.mulf %176, %178 : vector<2x32xf32>
    %182 = arith.addf %180, %181 : vector<2x32xf32>
    %183 = math.tanh %182 : vector<2x32xf32>
    %184 = arith.mulf %179, %183 : vector<2x32xf32>
    %c128_51 = arith.constant 128 : index
    %c0_52 = arith.constant 0 : index
    %185 = vector.load %arg1[%c128_51, %c0_52] : memref<257x8xf32, #tpu.memory_space<vmem>>, vector<32x8xf32>
    %186 = vector.extract_strided_slice %184 {offsets = [0, 0], sizes = [1, 32], strides = [1, 1]} : vector<2x32xf32> to vector<1x32xf32>
    %cst_53 = arith.constant dense<0.000000e+00> : vector<1x8xf32>
    %187 = tpu.matmul %186, %185, %cst_53 {dimension_numbers = #tpu.dot_dimension_numbers<[1], [0], [0], [1], [0, 0, 1, 1], [], []>} : vector<1x32xf32>, vector<32x8xf32>, vector<1x8xf32> -> vector<1x8xf32>
    %188 = arith.addf %166, %187 : vector<1x8xf32>
    %c160_54 = arith.constant 160 : index
    %c0_55 = arith.constant 0 : index
    %189 = vector.load %arg1[%c160_54, %c0_55] : memref<257x8xf32, #tpu.memory_space<vmem>>, vector<32x8xf32>
    %190 = vector.extract_strided_slice %184 {offsets = [1, 0], sizes = [1, 32], strides = [1, 1]} : vector<2x32xf32> to vector<1x32xf32>
    %cst_56 = arith.constant dense<0.000000e+00> : vector<1x8xf32>
    %191 = tpu.matmul %190, %189, %cst_56 {dimension_numbers = #tpu.dot_dimension_numbers<[1], [0], [0], [1], [0, 0, 1, 1], [], []>} : vector<1x32xf32>, vector<32x8xf32>, vector<1x8xf32> -> vector<1x8xf32>
    %192 = arith.addf %188, %191 : vector<1x8xf32>
    %193 = vector.extract_strided_slice %6 {offsets = [14, 0], sizes = [2, 128], strides = [1, 1]} : vector<16x128xf32> to vector<2x128xf32>
    %cst_57 = arith.constant dense<0.000000e+00> : vector<2x128xf32>
    %194 = tpu.matmul %184, %1, %cst_57 {dimension_numbers = #tpu.dot_dimension_numbers<[1], [0], [0], [1], [0, 0, 1, 1], [], []>} : vector<2x32xf32>, vector<32x128xf32>, vector<2x128xf32> -> vector<2x128xf32>
    %195 = arith.addf %193, %194 : vector<2x128xf32>
    %196 = arith.negf %195 : vector<2x128xf32>
    %197 = math.exp %196 : vector<2x128xf32>
    %cst_58 = arith.constant 1.000000e+00 : f32
    %198 = vector.broadcast %cst_58 : f32 to vector<2x128xf32>
    %199 = arith.addf %198, %197 : vector<2x128xf32>
    %200 = arith.divf %198, %199 : vector<2x128xf32>
    %201 = math.tanh %195 : vector<2x128xf32>
    %202 = vector.extract_strided_slice %200 {offsets = [0, 0], sizes = [2, 32], strides = [1, 1]} : vector<2x128xf32> to vector<2x32xf32>
    %203 = vector.extract_strided_slice %200 {offsets = [0, 32], sizes = [2, 32], strides = [1, 1]} : vector<2x128xf32> to vector<2x32xf32>
    %204 = vector.extract_strided_slice %201 {offsets = [0, 64], sizes = [2, 32], strides = [1, 1]} : vector<2x128xf32> to vector<2x32xf32>
    %205 = vector.extract_strided_slice %200 {offsets = [0, 96], sizes = [2, 32], strides = [1, 1]} : vector<2x128xf32> to vector<2x32xf32>
    %206 = arith.mulf %203, %182 : vector<2x32xf32>
    %207 = arith.mulf %202, %204 : vector<2x32xf32>
    %208 = arith.addf %206, %207 : vector<2x32xf32>
    %209 = math.tanh %208 : vector<2x32xf32>
    %210 = arith.mulf %205, %209 : vector<2x32xf32>
    %c192_59 = arith.constant 192 : index
    %c0_60 = arith.constant 0 : index
    %211 = vector.load %arg1[%c192_59, %c0_60] : memref<257x8xf32, #tpu.memory_space<vmem>>, vector<32x8xf32>
    %212 = vector.extract_strided_slice %210 {offsets = [0, 0], sizes = [1, 32], strides = [1, 1]} : vector<2x32xf32> to vector<1x32xf32>
    %cst_61 = arith.constant dense<0.000000e+00> : vector<1x8xf32>
    %213 = tpu.matmul %212, %211, %cst_61 {dimension_numbers = #tpu.dot_dimension_numbers<[1], [0], [0], [1], [0, 0, 1, 1], [], []>} : vector<1x32xf32>, vector<32x8xf32>, vector<1x8xf32> -> vector<1x8xf32>
    %214 = arith.addf %192, %213 : vector<1x8xf32>
    %c224_62 = arith.constant 224 : index
    %c0_63 = arith.constant 0 : index
    %215 = vector.load %arg1[%c224_62, %c0_63] : memref<257x8xf32, #tpu.memory_space<vmem>>, vector<32x8xf32>
    %216 = vector.extract_strided_slice %210 {offsets = [1, 0], sizes = [1, 32], strides = [1, 1]} : vector<2x32xf32> to vector<1x32xf32>
    %cst_64 = arith.constant dense<0.000000e+00> : vector<1x8xf32>
    %217 = tpu.matmul %216, %215, %cst_64 {dimension_numbers = #tpu.dot_dimension_numbers<[1], [0], [0], [1], [0, 0, 1, 1], [], []>} : vector<1x32xf32>, vector<32x8xf32>, vector<1x8xf32> -> vector<1x8xf32>
    %218 = arith.addf %214, %217 : vector<1x8xf32>
    %c256 = arith.constant 256 : index
    %c0_65 = arith.constant 0 : index
    %219 = vector.load %arg1[%c256, %c0_65] : memref<257x8xf32, #tpu.memory_space<vmem>>, vector<1x8xf32>
    %220 = arith.addf %114, %219 : vector<1x8xf32>
    %c0_66 = arith.constant 0 : index
    %c0_67 = arith.constant 0 : index
    %221 = vector.load %arg2[%c0_66, %c0_67] : memref<2x8xf32, #tpu.memory_space<vmem>>, vector<1x8xf32>
    tpu.vector_store %arg2[%c0_66, %c0_67], %220 {strides = array<i32>} : memref<2x8xf32, #tpu.memory_space<vmem>>, vector<1x8xf32>,
    %222 = arith.addf %218, %219 : vector<1x8xf32>
    %c1 = arith.constant 1 : index
    %c0_68 = arith.constant 0 : index
    %223 = vector.load %arg2[%c1, %c0_68] : memref<2x8xf32, #tpu.memory_space<vmem>>, vector<1x8xf32>
    tpu.vector_store %arg2[%c1, %c0_68], %222 {strides = array<i32>} : memref<2x8xf32, #tpu.memory_space<vmem>>, vector<1x8xf32>,
    return
  }
}

</mosaic_0001>

<bundles_post_ra>
// kernel: tpu_custom_call.1
= control target key start
LH: loop header
LB: loop body
LE: loop exit
PB: predicated region body
PF: predicated region fallthrough
CT: control target
= control target key end

     0   :  { %vm25_vm0 = vcmask 130048   ;;  %v2851_v3 = vmov 0.0|0.0   ;;  %vm2852_vm1 = vmmov 0   ;;  %v2853_v10 = vmov 0.0   ;;  %s3290_s0 = inlined_call_operand.vmem [shape: f32[72,128], index: 0, kind: input, shape index: {}]   ;;  %s3291_s1 = inlined_call_operand.vmem [shape: f32[257,8], index: 1, kind: input, shape index: {}]   ;;  %s3292_s2 = inlined_call_operand.hbm [shape: f32[2,8], index: 2, kind: output, shape index: {}]  }
   0x1   :  { %v12_v0 = vld [vmem:[%s3290_s0] sm:$0xff]  ;;  %v13_v1 = vld [vmem:[%s3290_s0 + $0x8] sm:$0xff]  ;;  %v14_v2 = vld [vmem:[%s3290_s0 + $0x10] sm:$0xff]  ;;  %2613 = vmatprep.subr.bf16.mxu1 %v2851_v3  ;;  %2353 = vmatprep.mubr.msk.f32.mxu1 %vm2852_vm1, %v2853_v10 }
   0x2   :  { %v2609_v4 = vpack.c.bf16 %v13_v1, %v12_v0  ;;  %v15_v5 = vld [vmem:[%s3290_s0 + $0x18] sm:$0xff]  ;;  %v16_v8 = vld [vmem:[%s3290_s0 + $0x20] sm:$0xff]  ;;  %v17_v9 = vld [vmem:[%s3290_s0 + $0x28] sm:$0xff] }
   0x3   :  { %v19_v6 = vld [vmem:[%s3290_s0 + $0x38] sm:$0xff]  ;;  %v2888_v7 = vpack.c.bf16 %v15_v5, %v14_v2 }
   0x4   :  { %2342 = vmatprep.mubr.msk.f32.mxu0 %vm25_vm0, %v19_v6 }
   0x5   :  { %7 = vsyncpa [#allocation3], 0  ;;  %2610 = vmatprep.subr.bf16.mxu0 %v2609_v4  ;;  %2615 = vmatpush3.bf16.msra.mxu1 %v2888_v7  ;;  %v20_v11 = vld [vmem:[%s3290_s0 + $0x40] sm:$0xff]  ;;  %v2903_v12 = vpack.c.bf16 %v17_v9, %v16_v8  ;;  %v2180_v13 = vld [vmem:[%s3290_s0 + $0x30] ss:$0 sm:$0xff]  ;;  %s2854_s27 = smov 64  }
   0x6   :  { %2612 = vmatpush3.bf16.msra.mxu0 %v2609_v4  ;;  %2616 = vmatprep.subr.bf16.mxu1 %v2851_v3  ;;  %s2855_s0 = smov 32   ;;  %v206_v31 = vld [vmem:[%s3291_s1] sm:$0xff]  ;;  %v207_v32 = vld [vmem:[%s3291_s1 + $0x8] sm:$0xff]  ;;  %v208_v36 = vld [vmem:[%s3291_s1 + $0x10] sm:$0xff]  ;;  %vm107_vm2 = vcmask 261120   ;;  %vm2162_vm3 = vcmask 57344  }
   0x7   :  { %2619 = vmatprep.subr.bf16.mxu0 %v2851_v3  ;;  %v210_v33 = vld [vmem:[%s3291_s1 + $0x20] sm:$0xff]  ;;  %v2937_v34 = vpack.c.bf16 %v207_v32, %v206_v31  ;;  %v211_v35 = vld [vmem:[%s3291_s1 + $0x28] sm:$0xff]  ;;  %v209_v37 = vld [vmem:[%s3291_s1 + $0x18] sm:$0xff] }
   0x8   :  { %v2948_v38 = vpack.c.bf16 %v211_v35, %v210_v33  ;;  %v212_v39 = vld [vmem:[%s3291_s1 + $0x30] sm:$0xff]  ;;  %v213_v40 = vld [vmem:[%s3291_s1 + $0x38] sm:$0xff]  ;;  %v2957_v41 = vpack.c.bf16 %v209_v37, %v208_v36  ;;  %v465_v6 = vld [vmem:[%s3291_s1 + $0x40] sm:$0xff] }
   0x9   :  { %2343 = vmatmul.mubr.msk.f32.vlgmr.msra.gmra.mrb[0].mxu0 %vm25_vm0, %v20_v11  ;;  %2618 = vmatpush3.bf16.msra.mxu1 %v2903_v12  ;;  %v2961_v42 = vpack.c.bf16 %v213_v40, %v212_v39  ;;  %v466_v8 = vld [vmem:[%s3291_s1 + $0x48] sm:$0xff]  ;;  %v467_v9 = vld [vmem:[%s3291_s1 + $0x50] sm:$0xff]  ;;  %v549_v39 = vld [vmem:[%s3291_s1 + $0x78] sm:$0xff] }
   0xa   :  { %2364 = vmatprep.mubr.msk.f32.mxu0 %vm2852_vm1, %v2853_v10  ;;  %2625 = vmatprep.subr.bf16.mxu1 %v2851_v3  ;;  %v2997_v11 = vpack.c.bf16 %v466_v8, %v465_v6  ;;  %v548_v37 = vld [vmem:[%s3291_s1 + $0x70] sm:$0xff] }
   0xb   :  { %2621 = vmatpush3.bf16.msra.mxu0 %v2948_v38  ;;  %v3038_v40 = vpack.c.bf16 %v549_v39, %v548_v37  ;;  %v989_v39 = vld [vmem:[%s3291_s1 + $0xc0] sm:$0xff] }
   0xc   :  { %2354 = vmatmul.mubr.f32.vlgmr.msra.gmra.mrb[0].mxu1 %v2853_v10  ;;  %2622 = vmatprep.subr.bf16.mxu0 %v2851_v3 }
   0xd   :  { %2375 = vmatprep.mubr.msk.f32.mxu1 %vm2852_vm1, %v2853_v10  ;;  %2627 = vmatpush3.bf16.msra.mxu1 %v2937_v34 }
   0xe   :  { %2628 = vmatprep.subr.bf16.mxu1 %v2851_v3 }
   0xf   :  { %2624 = vmatpush3.bf16.msra.mxu0 %v2961_v42 }
  0x10   :  { %2631 = vmatprep.subr.bf16.mxu0 %v2851_v3 }
  0x11   :  { %2630 = vmatpush3.bf16.msra.mxu1 %v2957_v41 }
  0x12   :  { %2637 = vmatprep.subr.bf16.mxu1 %v2851_v3 }
  0xdc   :  { %v2344_v14 = vpop.f32.mrb[0].mxu0 }
  0xdd   :  { %v2918_v15 = vadd.f32 %v2344_v14, %v2180_v13  ;;  %v98_v16 = vpop.f32.mrb[1].mxu0 }
  0xde   :  { %v2920_v17 = vadd.f32 %v2180_v13, %v98_v16  ;;  %v468_v13 = vld [vmem:[%s3291_s1 + $0x58] sm:$0xff] }
  0xdf   :  { %v177_v18 = vpop.f32.mrb[0].mxu1  ;;  %v3003_v14 = vpack.c.bf16 %v468_v13, %v467_v9 }
  0xe0   :  { %v181_v19 = vadd.f32 %v177_v18, %v2920_v17  ;;  %v2355_v20 = vpop.f32.mrb[1].mxu1 }
  0xe2   :  { %2763 = vtanh.f32 %v181_v19  ;;  %v2183_v22 = vmul.f32 -1.442695, %v181_v19 }
  0xe4   :  { %2765 = vpow2.f32 %v2183_v22 }
  0xec   :  { %v2764_v21 = vpop.eup %2763 }
  0xed   :  { %191 = vrot.lane.b32.xlu0 %v2764_v21, %s2854_s27 }
  0xee   :  { %v2766_v23 = vpop.eup %2765 }
  0xef   :  { %v185_v24 = vadd.f32 1.0, %v2766_v23 }
  0xf1   :  { %2767 = vrcp.f32 %v185_v24 }
  0xfb   :  { %v2768_v25 = vpop.eup %2767 }
  0xfc   :  { %v189_v28 = vmul.f32 0.0, %v2768_v25 }
 0x15f   :  { %v192_v26 = vpop.permute.xlu0 %191 }
 0x160   :  { %v194_v27 = vmul.f32 %v2768_v25, %v192_v26 }
 0x162   :  { %196 = vrot.lane.b32.xlu0 %v194_v27, %s2855_s0 }
 0x1d4   :  { %v197_v29 = vpop.permute.xlu0 %196 }
 0x1d5   :  { %v2925_v30 = vadd.f32 %v197_v29, %v189_v28  ;;  %v546_v29 = vld [vmem:[%s3291_s1 + $0x60] sm:$0xff] }
 0x1d7   :  { %2769 = vtanh.f32 %v2925_v30  ;;  %v446_v1 = vrot.slane %v2925_v30, 6  ;;  %v547_v30 = vld [vmem:[%s3291_s1 + $0x68] sm:$0xff] }
 0x1d8   :  { %v3027_v31 = vpack.c.bf16 %v547_v30, %v546_v29 }
 0x1e1   :  { %v2770_v43 = vpop.eup %2769 }
 0x1e2   :  { %202 = vrot.lane.b32.xlu1 %v2770_v43, %s2854_s27 }
 0x254   :  { %v203_v44 = vpop.permute.xlu1 %202 }
 0x255   :  { %v205_v45 = vmul.f32 %v2768_v25, %v203_v44 }
 0x257   :  { %v215_v46 = vrot.slane %v205_v45, 1  ;;  %290 = vrot.lane.b32.xlu0 %v205_v45, %s2855_s0 }
 0x259   :  { %216 = vrot.lane.b32.xlu1 %v215_v46, %s2855_s0 }
 0x2c9   :  { %v291_v47 = vpop.permute.xlu0 %290 }
 0x2ca   :  { %2376 = vmatmul.mubr.msk.f32.vlgmr.msra.gmra.mrb[2].mxu1 %vm107_vm2, %v291_v47 }
 0x2cb   :  { %v217_v48 = vpop.permute.xlu1 %216  ;;  %2397 = vmatprep.mubr.msk.f32.mxu1 %vm2852_vm1, %v2853_v10  ;;  %2639 = vmatpush3.bf16.msra.mxu1 %v2997_v11 }
 0x2cc   :  { %2365 = vmatmul.mubr.msk.f32.vlgmr.msra.gmra.mrb[2].mxu0 %vm107_vm2, %v217_v48  ;;  %2640 = vmatprep.subr.bf16.mxu1 %v2851_v3 }
 0x2cd   :  { %2633 = vmatpush3.bf16.msra.mxu0 %v2888_v7  ;;  %2386 = vmatprep.mubr.msk.f32.mxu0 %vm2852_vm1, %v2853_v10 }
 0x2ce   :  { %2634 = vmatprep.subr.bf16.mxu0 %v2851_v3 }
 0x2cf   :  { %2642 = vmatpush3.bf16.msra.mxu1 %v3003_v14 }
 0x2d0   :  { %2649 = vmatprep.subr.bf16.mxu1 %v2851_v3 }
 0x2d1   :  { %2636 = vmatpush3.bf16.msra.mxu0 %v2903_v12 }
 0x2d2   :  { %2643 = vmatprep.subr.bf16.mxu0 %v2851_v3 }
 0x2d4   :  { %2387 = vmatmul.mubr.msk.f32.vlgmr.msra.gmra.mrb[4].mxu0 %vm107_vm2, %v291_v47 }
 0x2d5   :  { %2408 = vmatprep.mubr.msk.f32.mxu0 %vm2852_vm1, %v2853_v10  ;;  %2645 = vmatpush3.bf16.msra.mxu0 %v3027_v31 }
 0x2d6   :  { %2646 = vmatprep.subr.bf16.mxu0 %v2851_v3 }
 0x2d9   :  { %2648 = vmatpush3.bf16.msra.mxu0 %v3038_v40 }
 0x2da   :  { %2655 = vmatprep.subr.bf16.mxu0 %v2851_v3 }
 0x39d   :  { %v360_v49 = vpop.f32.mrb[2].mxu1 }
 0x39e   :  { %v2377_v50 = vpop.f32.mrb[3].mxu1 }
 0x39f   :  { %v286_v51 = vpop.f32.mrb[2].mxu0 }
 0x3a0   :  { %v361_v52 = vadd.f32 %v360_v49, %v286_v51  ;;  %v2366_v53 = vpop.f32.mrb[3].mxu0 }
 0x3a1   :  { %v727_v53 = vld [vmem:[%s3291_s1 + $0x80] sm:$0xff] }
 0x3a7   :  { %v430_v54 = vpop.f32.mrb[4].mxu0 }
 0x3a8   :  { %v435_v55 = vrot.slane %v430_v54, 6  ;;  %v2388_v56 = vpop.f32.mrb[5].mxu0  ;;  %v728_v54 = vld [vmem:[%s3291_s1 + $0x88] sm:$0xff] }
 0x3a9   :  { %v3060_v56 = vpack.c.bf16 %v728_v54, %v727_v53 }
 0x3aa   :  { %v437_v57 = vadd.f32 %v435_v55, %v2920_v17  ;;  %v729_v55 = vld [vmem:[%s3291_s1 + $0x90] sm:$0xff] }
 0x3ac   :  { %2771 = vtanh.f32 %v437_v57  ;;  %v2187_v59 = vmul.f32 -1.442695, %v437_v57  ;;  %v730_v57 = vld [vmem:[%s3291_s1 + $0x98] sm:$0xff] }
 0x3ae   :  { %2773 = vpow2.f32 %v2187_v59 }
 0x3b6   :  { %v2772_v58 = vpop.eup %2771 }
 0x3b7   :  { %450 = vrot.lane.b32.xlu1 %v2772_v58, %s2854_s27  ;;  %v3066_v58 = vpack.c.bf16 %v730_v57, %v729_v55 }
 0x3b8   :  { %v2774_v60 = vpop.eup %2773 }
 0x3b9   :  { %v441_v61 = vadd.f32 1.0, %v2774_v60 }
 0x3bb   :  { %2775 = vrcp.f32 %v441_v61 }
 0x3c5   :  { %v2776_v62 = vpop.eup %2775 }
 0x3c6   :  { %v448_v2 = vmul.f32 %v2776_v62, %v446_v1 }
 0x429   :  { %v451_v63 = vpop.permute.xlu1 %450 }
 0x42a   :  { %v453_v0 = vmul.f32 %v2776_v62, %v451_v63 }
 0x42c   :  { %455 = vrot.lane.b32.xlu0 %v453_v0, %s2855_s0 }
 0x49e   :  { %v456_v4 = vpop.permute.xlu0 %455 }
 0x49f   :  { %v458_v5 = vadd.f32 %v456_v4, %v448_v2 }
 0x4a1   :  { %2777 = vtanh.f32 %v458_v5  ;;  %v708_v47 = vrot.slane %v458_v5, 6 }
 0x4ab   :  { %v2778_v16 = vpop.eup %2777 }
 0x4ac   :  { %461 = vrot.lane.b32.xlu1 %v2778_v16, %s2854_s27  ;;  %v808_v16 = vld [vmem:[%s3291_s1 + $0xa0] sm:$0xff] }
 0x51e   :  { %v462_v18 = vpop.permute.xlu1 %461 }
 0x51f   :  { %v464_v19 = vmul.f32 %v2776_v62, %v462_v18  ;;  %v809_v18 = vld [vmem:[%s3291_s1 + $0xa8] sm:$0xff] }
 0x521   :  { %v470_v20 = vrot.slane %v464_v19, 2  ;;  %v550_v46 = vrot.slane %v464_v19, 3  ;;  %v3089_v19 = vpack.c.bf16 %v809_v18, %v808_v16 }
 0x523   :  { %471 = vrot.lane.b32.xlu0 %v470_v20, %s2855_s0 }
 0x595   :  { %v472_v21 = vpop.permute.xlu0 %471 }
 0x596   :  { %2398 = vmatmul.mubr.msk.f32.vlgmr.msra.gmra.mrb[4].mxu1 %vm107_vm2, %v472_v21 }
 0x597   :  { %2651 = vmatpush3.bf16.msra.mxu1 %v2888_v7  ;;  %2419 = vmatprep.mubr.msk.f32.mxu1 %vm2852_vm1, %v2853_v10 }
 0x598   :  { %2652 = vmatprep.subr.bf16.mxu1 %v2851_v3 }
 0x59b   :  { %2654 = vmatpush3.bf16.msra.mxu1 %v2903_v12 }
 0x59c   :  { %2661 = vmatprep.subr.bf16.mxu1 %v2851_v3 }
 0x59e   :  { %2420 = vmatmul.mubr.msk.f32.vlgmr.msra.gmra.mrb[6].mxu1 %vm107_vm2, %v472_v21 }
 0x59f   :  { %2441 = vmatprep.mubr.msk.f32.mxu1 %vm2852_vm1, %v2853_v10  ;;  %2663 = vmatpush3.bf16.msra.mxu1 %v3089_v19 }
 0x5a0   :  { %2664 = vmatprep.subr.bf16.mxu1 %v2851_v3 }
 0x669   :  { %v541_v22 = vpop.f32.mrb[4].mxu1 }
 0x66a   :  { %v545_v23 = vadd.f32 %v541_v22, %v361_v52  ;;  %v2399_v24 = vpop.f32.mrb[5].mxu1 }
 0x66b   :  { %v811_v24 = vld [vmem:[%s3291_s1 + $0xb8] sm:$0xff] }
 0x671   :  { %v692_v25 = vpop.f32.mrb[6].mxu1 }
 0x672   :  { %v697_v26 = vrot.slane %v692_v25, 4  ;;  %v2421_v27 = vpop.f32.mrb[7].mxu1 }
 0x674   :  { %v699_v28 = vadd.f32 %v697_v26, %v2920_v17 }
 0x676   :  { %2779 = vtanh.f32 %v699_v28  ;;  %v2191_v33 = vmul.f32 -1.442695, %v699_v28 }
 0x678   :  { %2781 = vpow2.f32 %v2191_v33 }
 0x680   :  { %v2780_v32 = vpop.eup %2779 }
 0x681   :  { %712 = vrot.lane.b32.xlu1 %v2780_v32, %s2854_s27 }
 0x682   :  { %v2782_v35 = vpop.eup %2781 }
 0x683   :  { %v703_v36 = vadd.f32 1.0, %v2782_v35 }
 0x685   :  { %2783 = vrcp.f32 %v703_v36 }
 0x68f   :  { %v2784_v43 = vpop.eup %2783 }
 0x690   :  { %v710_v48 = vmul.f32 %v2784_v43, %v708_v47 }
 0x6f3   :  { %v713_v44 = vpop.permute.xlu1 %712 }
 0x6f4   :  { %v715_v45 = vmul.f32 %v2784_v43, %v713_v44  ;;  %v991_v44 = vld [vmem:[%s3291_s1 + $0xd0] sm:$0xff] }
 0x6f6   :  { %717 = vrot.lane.b32.xlu0 %v715_v45, %s2855_s0 }
 0x6fa   :  { %551 = vrot.lane.b32.xlu0 %v550_v46, %s2855_s0  ;;  %v992_v46 = vld [vmem:[%s3291_s1 + $0xd8] sm:$0xff] }
 0x6fb   :  { %v3129_v47 = vpack.c.bf16 %v992_v46, %v991_v44 }
 0x768   :  { %v718_v49 = vpop.permute.xlu0 %717 }
 0x769   :  { %v3044_v50 = vadd.f32 %v718_v49, %v710_v48 }
 0x76b   :  { %2785 = vtanh.f32 %v3044_v50  ;;  %v970_v30 = vrot.slane %v3044_v50, 6 }
 0x76c   :  { %v552_v51 = vpop.permute.xlu0 %551 }
 0x76d   :  { %2409 = vmatmul.mubr.msk.f32.vlgmr.msra.gmra.mrb[6].mxu0 %vm107_vm2, %v552_v51 }
 0x76e   :  { %2430 = vmatprep.mubr.msk.f32.mxu0 %vm2852_vm1, %v2853_v10  ;;  %2657 = vmatpush3.bf16.msra.mxu0 %v3060_v56 }
 0x76f   :  { %2658 = vmatprep.subr.bf16.mxu0 %v2851_v3 }
 0x772   :  { %2660 = vmatpush3.bf16.msra.mxu0 %v3066_v58 }
 0x773   :  { %2667 = vmatprep.subr.bf16.mxu0 %v2851_v3 }
 0x775   :  { %v2786_v52 = vpop.eup %2785 }
 0x776   :  { %723 = vrot.lane.b32.xlu1 %v2786_v52, %s2854_s27 }
 0x7e8   :  { %v724_v59 = vpop.permute.xlu1 %723 }
 0x7e9   :  { %v726_v60 = vmul.f32 %v2784_v43, %v724_v59  ;;  %v990_v43 = vld [vmem:[%s3291_s1 + $0xc8] sm:$0xff] }
 0x7ea   :  { %v3123_v45 = vpack.c.bf16 %v990_v43, %v989_v39 }
 0x7eb   :  { %v732_v61 = vrot.slane %v726_v60, 4  ;;  %v812_v29 = vrot.slane %v726_v60, 5 }
 0x7ed   :  { %733 = vrot.lane.b32.xlu1 %v732_v61, %s2855_s0 }
 0x840   :  { %v621_v62 = vpop.f32.mrb[6].mxu0 }
 0x841   :  { %v625_v63 = vadd.f32 %v621_v62, %v545_v23  ;;  %v2410_v0 = vpop.f32.mrb[7].mxu0  ;;  %v810_v23 = vld [vmem:[%s3291_s1 + $0xb0] sm:$0xff] }
 0x842   :  { %v3100_v25 = vpack.c.bf16 %v811_v24, %v810_v23 }
 0x844   :  { %2666 = vmatpush3.bf16.msra.mxu1 %v3100_v25 }
 0x845   :  { %2673 = vmatprep.subr.bf16.mxu1 %v2851_v3 }
 0x85f   :  { %v734_v1 = vpop.permute.xlu1 %733 }
 0x860   :  { %2431 = vmatmul.mubr.msk.f32.vlgmr.msra.gmra.mrb[8].mxu0 %vm107_vm2, %v734_v1 }
 0x861   :  { %2669 = vmatpush3.bf16.msra.mxu0 %v2888_v7  ;;  %2452 = vmatprep.mubr.msk.f32.mxu0 %vm2852_vm1, %v2853_v10 }
 0x862   :  { %2670 = vmatprep.subr.bf16.mxu0 %v2851_v3 }
 0x865   :  { %2672 = vmatpush3.bf16.msra.mxu0 %v2903_v12 }
 0x866   :  { %2679 = vmatprep.subr.bf16.mxu0 %v2851_v3 }
 0x868   :  { %2453 = vmatmul.mubr.msk.f32.vlgmr.msra.gmra.mrb[10].mxu0 %vm107_vm2, %v734_v1 }
 0x869   :  { %2474 = vmatprep.mubr.msk.f32.mxu0 %vm2852_vm1, %v2853_v10 }
 0x933   :  { %v803_v2 = vpop.f32.mrb[8].mxu0 }
 0x934   :  { %v807_v4 = vadd.f32 %v803_v2, %v625_v63  ;;  %v2432_v5 = vpop.f32.mrb[9].mxu0  ;;  %v1071_v63 = vld [vmem:[%s3291_s1 + $0xe8] sm:$0xff] }
 0x935   :  { %v1072_v5 = vld [vmem:[%s3291_s1 + $0xf0] sm:$0xff] }
 0x93b   :  { %v954_v6 = vpop.f32.mrb[10].mxu0 }
 0x93c   :  { %v959_v8 = vrot.slane %v954_v6, 2  ;;  %v2454_v9 = vpop.f32.mrb[11].mxu0  ;;  %v1073_v6 = vld [vmem:[%s3291_s1 + $0xf8] sm:$0xff] }
 0x93e   :  { %v961_v13 = vadd.f32 %v959_v8, %v2920_v17  ;;  %v3167_v8 = vpack.c.bf16 %v1073_v6, %v1072_v5 }
 0x940   :  { %2787 = vtanh.f32 %v961_v13  ;;  %v2195_v21 = vmul.f32 -1.442695, %v961_v13 }
 0x942   :  { %2789 = vpow2.f32 %v2195_v21 }
 0x94a   :  { %v2788_v20 = vpop.eup %2787 }
 0x94b   :  { %974 = vrot.lane.b32.xlu0 %v2788_v20, %s2854_s27 }
 0x94c   :  { %v2790_v17 = vpop.eup %2789 }
 0x94d   :  { %v965_v22 = vadd.f32 1.0, %v2790_v17 }
 0x94f   :  { %2791 = vrcp.f32 %v965_v22 }
 0x959   :  { %v2792_v26 = vpop.eup %2791 }
 0x95a   :  { %v972_v32 = vmul.f32 %v2792_v26, %v970_v30 }
 0x9bd   :  { %v975_v27 = vpop.permute.xlu0 %974 }
 0x9be   :  { %v977_v28 = vmul.f32 %v2792_v26, %v975_v27 }
 0x9c0   :  { %979 = vrot.lane.b32.xlu1 %v977_v28, %s2855_s0 }
 0x9c4   :  { %813 = vrot.lane.b32.xlu1 %v812_v29, %s2855_s0  ;;  %v3190_v29 = vld [vmem:[%s3291_s1 + $0x100] sm:$0x1] }
 0xa32   :  { %v980_v33 = vpop.permute.xlu1 %979 }
 0xa33   :  { %v3107_v35 = vadd.f32 %v980_v33, %v972_v32 }
 0xa35   :  { %2793 = vtanh.f32 %v3107_v35  ;;  %v1229_v20 = vrot.slane %v3107_v35, 6 }
 0xa36   :  { %v814_v36 = vpop.permute.xlu1 %813 }
 0xa37   :  { %2442 = vmatmul.mubr.msk.f32.vlgmr.msra.gmra.mrb[8].mxu1 %vm107_vm2, %v814_v36 }
 0xa38   :  { %2463 = vmatprep.mubr.msk.f32.mxu1 %vm2852_vm1, %v2853_v10  ;;  %2675 = vmatpush3.bf16.msra.mxu1 %v3123_v45 }
 0xa39   :  { %2676 = vmatprep.subr.bf16.mxu1 %v2851_v3 }
 0xa3c   :  { %2678 = vmatpush3.bf16.msra.mxu1 %v3129_v47 }
 0xa3d   :  { %2685 = vmatprep.subr.bf16.mxu1 %v2851_v3 }
 0xa3f   :  { %v2794_v37 = vpop.eup %2793 }
 0xa40   :  { %985 = vrot.lane.b32.xlu0 %v2794_v37, %s2854_s27 }
 0xab2   :  { %v986_v48 = vpop.permute.xlu0 %985 }
 0xab3   :  { %v988_v49 = vmul.f32 %v2792_v26, %v986_v48 }
 0xab5   :  { %v994_v50 = vrot.slane %v988_v49, 6  ;;  %v1074_v18 = vrot.slane %v988_v49, 7 }
 0xab7   :  { %995 = vrot.lane.b32.xlu0 %v994_v50, %s2855_s0 }
 0xb0a   :  { %v883_v51 = vpop.f32.mrb[8].mxu1 }
 0xb0b   :  { %v887_v52 = vadd.f32 %v883_v51, %v807_v4  ;;  %v2443_v53 = vpop.f32.mrb[9].mxu1 }
 0xb29   :  { %v996_v54 = vpop.permute.xlu0 %995 }
 0xb2a   :  { %2464 = vmatmul.mubr.msk.f32.vlgmr.msra.gmra.mrb[10].mxu1 %vm107_vm2, %v996_v54 }
 0xb2b   :  { %2687 = vmatpush3.bf16.msra.mxu1 %v2888_v7  ;;  %2485 = vmatprep.mubr.msk.f32.mxu1 %vm2852_vm1, %v2853_v10 }
 0xb2c   :  { %2688 = vmatprep.subr.bf16.mxu1 %v2851_v3 }
 0xb2f   :  { %2690 = vmatpush3.bf16.msra.mxu1 %v2903_v12 }
 0xb30   :  { %2697 = vmatprep.subr.bf16.mxu1 %v2851_v3 }
 0xb32   :  { %2486 = vmatmul.mubr.msk.f32.vlgmr.msra.gmra.mrb[12].mxu1 %vm107_vm2, %v996_v54 }
 0xb33   :  { %2699 = vmatpush3.bf16.msra.mxu1 %v2937_v34  ;;  %2507 = vmatprep.mubr.msk.f32.mxu1 %vm2852_vm1, %v2853_v10  ;;  %v1070_v34 = vld [vmem:[%s3291_s1 + $0xe0] sm:$0xff]  ;;  %s2856_s1 = smov [#allocation2]  }
 0xb34   :  { %2700 = vmatprep.subr.bf16.mxu1 %v2851_v3  ;;  %v3156_v0 = vpack.c.bf16 %v1071_v63, %v1070_v34 }
 0xb36   :  { %2681 = vmatpush3.bf16.msra.mxu0 %v3156_v0 }
 0xb37   :  { %2702 = vmatpush3.bf16.msra.mxu1 %v2957_v41  ;;  %2682 = vmatprep.subr.bf16.mxu0 %v2851_v3 }
 0xb38   :  { %2709 = vmatprep.subr.bf16.mxu1 %v2851_v3 }
 0xb3a   :  { %2684 = vmatpush3.bf16.msra.mxu0 %v3167_v8 }
 0xb3b   :  { %2691 = vmatprep.subr.bf16.mxu0 %v2851_v3 }
 0xbfd   :  { %v1065_v55 = vpop.f32.mrb[10].mxu1 }
 0xbfe   :  { %v1069_v57 = vadd.f32 %v1065_v55, %v887_v52  ;;  %v2465_v59 = vpop.f32.mrb[11].mxu1 }
 0xc05   :  { %v1216_v60 = vpop.f32.mrb[12].mxu1 }
 0xc06   :  { %v1220_v61 = vadd.f32 %v1216_v60, %v2918_v15  ;;  %v2487_v62 = vpop.f32.mrb[13].mxu1 }
 0xc08   :  { %2795 = vtanh.f32 %v1220_v61  ;;  %v2199_v1 = vmul.f32 -1.442695, %v1220_v61 }
 0xc0a   :  { %2797 = vpow2.f32 %v2199_v1 }
 0xc12   :  { %v2796_v41 = vpop.eup %2795 }
 0xc13   :  { %1233 = vrot.lane.b32.xlu1 %v2796_v41, %s2854_s27 }
 0xc14   :  { %v2798_v2 = vpop.eup %2797 }
 0xc15   :  { %v1224_v4 = vadd.f32 1.0, %v2798_v2 }
 0xc17   :  { %2799 = vrcp.f32 %v1224_v4 }
 0xc21   :  { %v2800_v9 = vpop.eup %2799 }
 0xc22   :  { %v1231_v21 = vmul.f32 %v2800_v9, %v1229_v20 }
 0xc85   :  { %v1234_v13 = vpop.permute.xlu1 %1233 }
 0xc86   :  { %v1236_v16 = vmul.f32 %v2800_v9, %v1234_v13 }
 0xc88   :  { %1238 = vrot.lane.b32.xlu0 %v1236_v16, %s2855_s0 }
 0xc8c   :  { %1075 = vrot.lane.b32.xlu0 %v1074_v18, %s2855_s0 }
 0xcfa   :  { %v1239_v17 = vpop.permute.xlu0 %1238 }
 0xcfb   :  { %v3174_v22 = vadd.f32 %v1239_v17, %v1231_v21 }
 0xcfd   :  { %2801 = vtanh.f32 %v3174_v22  ;;  %v1480_v54 = vrot.slane %v3174_v22, 6 }
 0xcfe   :  { %v1076_v23 = vpop.permute.xlu0 %1075 }
 0xcff   :  { %2475 = vmatmul.mubr.msk.f32.vlgmr.msra.gmra.mrb[12].mxu0 %vm107_vm2, %v1076_v23 }
 0xd00   :  { %2693 = vmatpush3.bf16.msra.mxu0 %v2948_v38  ;;  %2496 = vmatprep.mubr.msk.f32.mxu0 %vm2852_vm1, %v2853_v10 }
 0xd01   :  { %2694 = vmatprep.subr.bf16.mxu0 %v2851_v3 }
 0xd04   :  { %2696 = vmatpush3.bf16.msra.mxu0 %v2961_v42 }
 0xd05   :  { %2703 = vmatprep.subr.bf16.mxu0 %v2851_v3 }
 0xd07   :  { %v2802_v24 = vpop.eup %2801 }
 0xd08   :  { %1244 = vrot.lane.b32.xlu1 %v2802_v24, %s2854_s27 }
 0xd7a   :  { %v1245_v26 = vpop.permute.xlu1 %1244 }
 0xd7b   :  { %v1247_v27 = vmul.f32 %v2800_v9, %v1245_v26 }
 0xd7d   :  { %v1249_v28 = vrot.slane %v1247_v27, 1  ;;  %1324 = vrot.lane.b32.xlu0 %v1247_v27, %s2855_s0 }
 0xd7f   :  { %1250 = vrot.lane.b32.xlu1 %v1249_v28, %s2855_s0 }
 0xdd2   :  { %v1145_v38 = vpop.f32.mrb[12].mxu0 }
 0xdd3   :  { %v1149_v30 = vadd.f32 %v1145_v38, %v1069_v57  ;;  %v2476_v42 = vpop.f32.mrb[13].mxu0 }
 0xdd5   :  { %v2161_v32 = vadd.f32 %v3190_v29, %v1149_v30 }
 0xdd7   :  { %2163 = vst.msk [vmem:[#allocation2] sm:$0x1] %vm2162_vm3, %v2161_v32 }
 0xdef   :  { %v1325_v33 = vpop.permute.xlu0 %1324 }
 0xdf0   :  { %2508 = vmatmul.mubr.msk.f32.vlgmr.msra.gmra.mrb[14].mxu1 %vm107_vm2, %v1325_v33 }
 0xdf1   :  { %v1251_v35 = vpop.permute.xlu1 %1250  ;;  %2711 = vmatpush3.bf16.msra.mxu1 %v2997_v11  ;;  %2529 = vmatprep.mubr.msk.f32.mxu1 %vm2852_vm1, %v2853_v10 }
 0xdf2   :  { %2497 = vmatmul.mubr.msk.f32.vlgmr.msra.gmra.mrb[14].mxu0 %vm107_vm2, %v1251_v35  ;;  %2712 = vmatprep.subr.bf16.mxu1 %v2851_v3 }
 0xdf3   :  { %2705 = vmatpush3.bf16.msra.mxu0 %v2888_v7  ;;  %2518 = vmatprep.mubr.msk.f32.mxu0 %vm2852_vm1, %v2853_v10 }
 0xdf4   :  { %2706 = vmatprep.subr.bf16.mxu0 %v2851_v3 }
 0xdf5   :  { %2714 = vmatpush3.bf16.msra.mxu1 %v3003_v14 }
 0xdf6   :  { %2721 = vmatprep.subr.bf16.mxu1 %v2851_v3 }
 0xdf7   :  { %2708 = vmatpush3.bf16.msra.mxu0 %v2903_v12 }
 0xdf8   :  { %2715 = vmatprep.subr.bf16.mxu0 %v2851_v3 }
 0xdfa   :  { %2519 = vmatmul.mubr.msk.f32.vlgmr.msra.gmra.mrb[16].mxu0 %vm107_vm2, %v1325_v33 }
 0xdfb   :  { %2717 = vmatpush3.bf16.msra.mxu0 %v3027_v31  ;;  %2540 = vmatprep.mubr.msk.f32.mxu0 %vm2852_vm1, %v2853_v10 }
 0xdfc   :  { %2718 = vmatprep.subr.bf16.mxu0 %v2851_v3 }
 0xdff   :  { %2720 = vmatpush3.bf16.msra.mxu0 %v3038_v40 }
 0xe00   :  { %2727 = vmatprep.subr.bf16.mxu0 %v2851_v3 }
 0xec3   :  { %v1394_v11 = vpop.f32.mrb[14].mxu1 }
 0xec4   :  { %v2509_v14 = vpop.f32.mrb[15].mxu1 }
 0xec5   :  { %v1320_v36 = vpop.f32.mrb[14].mxu0 }
 0xec6   :  { %v1395_v37 = vadd.f32 %v1394_v11, %v1320_v36  ;;  %v2498_v39 = vpop.f32.mrb[15].mxu0 }
 0xecd   :  { %v1464_v43 = vpop.f32.mrb[16].mxu0 }
 0xece   :  { %v1469_v44 = vrot.slane %v1464_v43, 6  ;;  %v2520_v46 = vpop.f32.mrb[17].mxu0 }
 0xed0   :  { %v1471_v48 = vadd.f32 %v1469_v44, %v2918_v15 }
 0xed2   :  { %2803 = vtanh.f32 %v1471_v48  ;;  %v2203_v49 = vmul.f32 -1.442695, %v1471_v48 }
 0xed4   :  { %2805 = vpow2.f32 %v2203_v49 }
 0xedc   :  { %v2804_v31 = vpop.eup %2803 }
 0xedd   :  { %1484 = vrot.lane.b32.xlu1 %v2804_v31, %s2854_s27 }
 0xede   :  { %v2806_v50 = vpop.eup %2805 }
 0xedf   :  { %v1475_v40 = vadd.f32 1.0, %v2806_v50 }
 0xee1   :  { %2807 = vrcp.f32 %v1475_v40 }
 0xeeb   :  { %v2808_v51 = vpop.eup %2807 }
 0xeec   :  { %v1482_v55 = vmul.f32 %v2808_v51, %v1480_v54 }
 0xf4f   :  { %v1485_v52 = vpop.permute.xlu1 %1484 }
 0xf50   :  { %v1487_v53 = vmul.f32 %v2808_v51, %v1485_v52 }
 0xf52   :  { %1489 = vrot.lane.b32.xlu0 %v1487_v53, %s2855_s0 }
 0xfc4   :  { %v1490_v57 = vpop.permute.xlu0 %1489 }
 0xfc5   :  { %v1492_v59 = vadd.f32 %v1490_v57, %v1482_v55 }
 0xfc7   :  { %2809 = vtanh.f32 %v1492_v59  ;;  %v1734_v22 = vrot.slane %v1492_v59, 6 }
 0xfd1   :  { %v2810_v60 = vpop.eup %2809 }
 0xfd2   :  { %1495 = vrot.lane.b32.xlu1 %v2810_v60, %s2854_s27 }
0x1044   :  { %v1496_v61 = vpop.permute.xlu1 %1495 }
0x1045   :  { %v1498_v62 = vmul.f32 %v2808_v51, %v1496_v61 }
0x1047   :  { %v1500_v34 = vrot.slane %v1498_v62, 2  ;;  %v1576_v17 = vrot.slane %v1498_v62, 3 }
0x1049   :  { %1501 = vrot.lane.b32.xlu0 %v1500_v34, %s2855_s0 }
0x10bb   :  { %v1502_v63 = vpop.permute.xlu0 %1501 }
0x10bc   :  { %2530 = vmatmul.mubr.msk.f32.vlgmr.msra.gmra.mrb[16].mxu1 %vm107_vm2, %v1502_v63 }
0x10bd   :  { %2723 = vmatpush3.bf16.msra.mxu1 %v2888_v7  ;;  %2551 = vmatprep.mubr.msk.f32.mxu1 %vm2852_vm1, %v2853_v10 }
0x10be   :  { %2724 = vmatprep.subr.bf16.mxu1 %v2851_v3 }
0x10c1   :  { %2726 = vmatpush3.bf16.msra.mxu1 %v2903_v12 }
0x10c2   :  { %2733 = vmatprep.subr.bf16.mxu1 %v2851_v3 }
0x10c4   :  { %2552 = vmatmul.mubr.msk.f32.vlgmr.msra.gmra.mrb[18].mxu1 %vm107_vm2, %v1502_v63 }
0x10c5   :  { %2735 = vmatpush3.bf16.msra.mxu1 %v3089_v19  ;;  %2573 = vmatprep.mubr.msk.f32.mxu1 %vm2852_vm1, %v2853_v10 }
0x10c6   :  { %2736 = vmatprep.subr.bf16.mxu1 %v2851_v3 }
0x10c9   :  { %2738 = vmatpush3.bf16.msra.mxu1 %v3100_v25 }
0x10ca   :  { %2745 = vmatprep.subr.bf16.mxu1 %v2851_v3 }
0x118f   :  { %v1571_v41 = vpop.f32.mrb[16].mxu1 }
0x1190   :  { %v1575_v1 = vadd.f32 %v1571_v41, %v1395_v37  ;;  %v2531_v2 = vpop.f32.mrb[17].mxu1 }
0x1197   :  { %v1718_v4 = vpop.f32.mrb[18].mxu1 }
0x1198   :  { %v1723_v5 = vrot.slane %v1718_v4, 4  ;;  %v2553_v6 = vpop.f32.mrb[19].mxu1 }
0x119a   :  { %v1725_v9 = vadd.f32 %v1723_v5, %v2918_v15 }
0x119c   :  { %2811 = vtanh.f32 %v1725_v9  ;;  %v2207_v19 = vmul.f32 -1.442695, %v1725_v9 }
0x119e   :  { %2813 = vpow2.f32 %v2207_v19 }
0x11a6   :  { %v2812_v13 = vpop.eup %2811 }
0x11a7   :  { %1738 = vrot.lane.b32.xlu1 %v2812_v13, %s2854_s27 }
0x11a8   :  { %v2814_v16 = vpop.eup %2813 }
0x11a9   :  { %v1729_v18 = vadd.f32 1.0, %v2814_v16 }
0x11ab   :  { %2815 = vrcp.f32 %v1729_v18 }
0x11b5   :  { %v2816_v25 = vpop.eup %2815 }
0x11b6   :  { %v1736_v23 = vmul.f32 %v2816_v25, %v1734_v22 }
0x1219   :  { %v1739_v20 = vpop.permute.xlu1 %1738 }
0x121a   :  { %v1741_v21 = vmul.f32 %v2816_v25, %v1739_v20 }
0x121c   :  { %1743 = vrot.lane.b32.xlu0 %v1741_v21, %s2855_s0 }
0x1220   :  { %1577 = vrot.lane.b32.xlu0 %v1576_v17, %s2855_s0 }
0x128e   :  { %v1744_v24 = vpop.permute.xlu0 %1743 }
0x128f   :  { %v1746_v26 = vadd.f32 %v1744_v24, %v1736_v23 }
0x1291   :  { %2817 = vtanh.f32 %v1746_v26  ;;  %v1988_v49 = vrot.slane %v1746_v26, 6 }
0x1292   :  { %v1578_v27 = vpop.permute.xlu0 %1577 }
0x1293   :  { %2541 = vmatmul.mubr.msk.f32.vlgmr.msra.gmra.mrb[18].mxu0 %vm107_vm2, %v1578_v27 }
0x1294   :  { %2729 = vmatpush3.bf16.msra.mxu0 %v3060_v56  ;;  %2562 = vmatprep.mubr.msk.f32.mxu0 %vm2852_vm1, %v2853_v10 }
0x1295   :  { %2730 = vmatprep.subr.bf16.mxu0 %v2851_v3 }
0x1298   :  { %2732 = vmatpush3.bf16.msra.mxu0 %v3066_v58 }
0x1299   :  { %2739 = vmatprep.subr.bf16.mxu0 %v2851_v3 }
0x129b   :  { %v2818_v28 = vpop.eup %2817 }
0x129c   :  { %1749 = vrot.lane.b32.xlu1 %v2818_v28, %s2854_s27 }
0x130e   :  { %v1750_v38 = vpop.permute.xlu1 %1749 }
0x130f   :  { %v1752_v30 = vmul.f32 %v2816_v25, %v1750_v38 }
0x1311   :  { %v1754_v42 = vrot.slane %v1752_v30, 4  ;;  %v1830_v31 = vrot.slane %v1752_v30, 5 }
0x1313   :  { %1755 = vrot.lane.b32.xlu1 %v1754_v42, %s2855_s0 }
0x1366   :  { %v1647_v32 = vpop.f32.mrb[18].mxu0 }
0x1367   :  { %v1651_v33 = vadd.f32 %v1647_v32, %v1575_v1  ;;  %v2542_v56 = vpop.f32.mrb[19].mxu0 }
0x1385   :  { %v1756_v35 = vpop.permute.xlu1 %1755 }
0x1386   :  { %2563 = vmatmul.mubr.msk.f32.vlgmr.msra.gmra.mrb[20].mxu0 %vm107_vm2, %v1756_v35 }
0x1387   :  { %2741 = vmatpush3.bf16.msra.mxu0 %v2888_v7  ;;  %2584 = vmatprep.mubr.msk.f32.mxu0 %vm2852_vm1, %v2853_v10 }
0x1388   :  { %2742 = vmatprep.subr.bf16.mxu0 %v2851_v3 }
0x138b   :  { %2744 = vmatpush3.bf16.msra.mxu0 %v2903_v12 }
0x138c   :  { %2751 = vmatprep.subr.bf16.mxu0 %v2851_v3 }
0x138e   :  { %2585 = vmatmul.mubr.msk.f32.vlgmr.msra.gmra.mrb[22].mxu0 %vm107_vm2, %v1756_v35 }
0x138f   :  { %2753 = vmatpush3.bf16.msra.mxu0 %v3156_v0  ;;  %2606 = vmatprep.mubr.msk.f32.mxu0 %vm2852_vm1, %v2853_v10 }
0x1390   :  { %2754 = vmatprep.subr.bf16.mxu0 %v2851_v3 }
0x1393   :  { %2756 = vmatpush3.bf16.msra.mxu0 %v3167_v8 }
0x1459   :  { %v1825_v7 = vpop.f32.mrb[20].mxu0 }
0x145a   :  { %v1829_v58 = vadd.f32 %v1825_v7, %v1651_v33  ;;  %v2564_v11 = vpop.f32.mrb[21].mxu0 }
0x1461   :  { %v1972_v14 = vpop.f32.mrb[22].mxu0 }
0x1462   :  { %v1977_v36 = vrot.slane %v1972_v14, 2  ;;  %v2586_v37 = vpop.f32.mrb[23].mxu0 }
0x1464   :  { %v1979_v12 = vadd.f32 %v1977_v36, %v2918_v15 }
0x1466   :  { %2819 = vtanh.f32 %v1979_v12  ;;  %v2211_v0 = vmul.f32 -1.442695, %v1979_v12 }
0x1468   :  { %2821 = vpow2.f32 %v2211_v0 }
0x1470   :  { %v2820_v39 = vpop.eup %2819 }
0x1471   :  { %1992 = vrot.lane.b32.xlu0 %v2820_v39, %s2854_s27 }
0x1472   :  { %v2822_v43 = vpop.eup %2821 }
0x1473   :  { %v1983_v44 = vadd.f32 1.0, %v2822_v43 }
0x1475   :  { %2823 = vrcp.f32 %v1983_v44 }
0x147f   :  { %v2824_v46 = vpop.eup %2823 }
0x1480   :  { %v1990_v50 = vmul.f32 %v2824_v46, %v1988_v49 }
0x14e3   :  { %v1993_v48 = vpop.permute.xlu0 %1992 }
0x14e4   :  { %v1995_v8 = vmul.f32 %v2824_v46, %v1993_v48 }
0x14e6   :  { %1997 = vrot.lane.b32.xlu1 %v1995_v8, %s2855_s0 }
0x14ea   :  { %1831 = vrot.lane.b32.xlu1 %v1830_v31, %s2855_s0 }
0x1558   :  { %v1998_v15 = vpop.permute.xlu1 %1997 }
0x1559   :  { %v2000_v40 = vadd.f32 %v1998_v15, %v1990_v50 }
0x155b   :  { %2825 = vtanh.f32 %v2000_v40 }
0x155c   :  { %v1832_v51 = vpop.permute.xlu1 %1831 }
0x155d   :  { %2574 = vmatmul.mubr.msk.f32.vlgmr.msra.gmra.mrb[20].mxu1 %vm107_vm2, %v1832_v51 }
0x155e   :  { %2747 = vmatpush3.bf16.msra.mxu1 %v3123_v45  ;;  %2595 = vmatprep.mubr.msk.f32.mxu1 %vm2852_vm1, %v2853_v10 }
0x155f   :  { %2748 = vmatprep.subr.bf16.mxu1 %v2851_v3 }
0x1562   :  { %2750 = vmatpush3.bf16.msra.mxu1 %v3129_v47 }
0x1565   :  { %v2826_v52 = vpop.eup %2825 }
0x1566   :  { %2003 = vrot.lane.b32.xlu0 %v2826_v52, %s2854_s27  ;;  %s2172_s27 = sshll.u32 %s2856_s1, 4  ;;  %s2173_s27 = int_to_ptr.vmem [resolvable:$true] %s2172_s27 }
0x1567   :  { %p2832_p1 = scmp.lt.s32.totalorder %s2173_s27, %s2173_s27 }
0x15d8   :  { %v2004_v53 = vpop.permute.xlu0 %2003 }
0x15d9   :  { %v2006_v54 = vmul.f32 %v2824_v46, %v2004_v53 }
0x15db   :  { %v2008_v55 = vrot.slane %v2006_v54, 6  ;;  %v2084_v57 = vrot.slane %v2006_v54, 7 }
0x15dd   :  { %2085 = vrot.lane.b32.xlu1 %v2084_v57, %s2855_s0  ;;  %2009 = vrot.lane.b32.xlu0 %v2008_v55, %s2855_s0  ;;  %s2827_s0 = scalar_lea.vmem %s2173_s27, 32 }
0x15de   :  { %p2828_p0 = scmp.ne.s32.totalorder %s2173_s27, %s2827_s0  ;;  %p2833_p2 = scmp.lt.s32.totalorder %s2827_s0, %s2827_s0 }
0x15e0   :  { %p2834_p3 = por %p2833_p2, %p2832_p1 }
0x15e2   :  { %p2835_p4 = pnand %p2834_p3, %p2828_p0 }
0x1630   :  { %v1901_v59 = vpop.f32.mrb[20].mxu1 }
0x1631   :  { %v1905_v45 = vadd.f32 %v1901_v59, %v1829_v58  ;;  %v2575_v60 = vpop.f32.mrb[21].mxu1 }
0x164f   :  { %v2086_v61 = vpop.permute.xlu1 %2085  ;;  %v2010_v10 = vpop.permute.xlu0 %2009 }
0x1650   :  { %2596 = vmatmul.mubr.msk.f32.vlgmr.msra.gmra.mrb[22].mxu1 %vm107_vm2, %v2010_v10  ;;  %2607 = vmatmul.mubr.msk.f32.vlgmr.msra.gmra.mrb[24].mxu0 %vm107_vm2, %v2086_v61 }
0x1723   :  { %v2079_v3 = vpop.f32.mrb[22].mxu1  ;;  %v2155_v47 = vpop.f32.mrb[24].mxu0 }
0x1724   :  { %v2083_v62 = vadd.f32 %v2079_v3, %v1905_v45  ;;  %v2597_v34 = vpop.f32.mrb[23].mxu1  ;;  %v2608_v63 = vpop.f32.mrb[25].mxu0 }
0x1726   :  { %v2159_v41 = vadd.f32 %v2155_v47, %v2083_v62 }
0x1728   :  { %v2164_v1 = vadd.f32 %v3190_v29, %v2159_v41 }
0x172a   :  { %2165 = vst.msk [vmem:[#allocation2 + $0x1] sm:$0x1] %vm2162_vm3, %v2164_v1 }
0x172b   :  { %2838 = shalt.err (!%p2835_p4)
}
0x172c   :  { %s2839_s14 = scalar_lea.hbm %s3292_s2, 32 }
0x172d   :  { %p2840_p5 = scmp.ne.s32.totalorder %s3292_s2, %s2839_s14  ;;  %p2843_p6 = scmp.lt.u32.totalorder %s2839_s14, %s3292_s2 }
0x172f   :  { %p2845_p7 = pnand %p2843_p6, %p2840_p5 }
0x1731   :  { %2848 = shalt.err (!%p2845_p7)
}
0x1732   :  { %2175 = dma.vmem_to_hbm [thread:$0]  %s2173_s27, 32, %s3292_s2, [#allocation3]  }
0x1733   :  { %2849 = dma.done.wait [#allocation3], 32  }
0x1734   :  { %2850 = vsyncadd [#allocation3], 4294967264 }
0x1735   :  { %2179 = vsyncpa [#allocation3], 1 }

</bundles_post_ra>
